<compile_context>
chip_gen: v7x
topology: tpu7x:2x2x1
jax: 0.10.0
libtpu: 0.0.40
codegen_flags: <defaults>
</compile_context>

<pallas_src>
import functools

import jax
import jax.numpy as jnp
from jax.experimental import pallas as pl
from jax.experimental.pallas import tpu as pltpu

_SUBLANE = 8


def _vmem_capacity_bytes():
    """Physical VMEM per TensorCore; conservative (v7x-sized) fallback."""
    try:
        info = pltpu.get_tpu_info()
        cap = getattr(info, "vmem_capacity_bytes", None)
        if cap:
            return int(cap)
    except Exception:
        pass
    return 64 * 1024 * 1024


def _ce_ls_kernel(x_ref, t_ref, loss_ref, *, eps, num_classes, b_true, tile_b):
    # x_ref   : (tile_b, K)  logits (native dtype) in VMEM
    # t_ref   : (tile_b, 1)  int32 labels in VMEM
    # loss_ref: (8, 1)       f32 per-tile partial sum (row 0), zeros elsewhere
    x = x_ref[...].astype(jnp.float32)                       # upcast after load
    t = t_ref[...]                                            # (tile_b, 1)

    k = x.shape[1]
    # Lane-only iota; the broadcast to (tile_b, K) happens inside the compare.
    class_ids = jax.lax.broadcasted_iota(jnp.int32, (1, k), 1)

    # Numerically stable per-row logsumexp; exp(x - m) is the only full-tile
    # transcendental pass and is consumed directly by the lane reduce.
    m = jnp.max(x, axis=1, keepdims=True)                     # (tile_b, 1)
    lse = jnp.log(jnp.sum(jnp.exp(x - m), axis=1, keepdims=True))

    # Fused smoothed-target reduction:
    #   sum_k x_k * ((1-eps) * 1[k==y] + eps/K)
    # Algebraic collapse of -sum_k smooth_k * log_softmax(x)_k given
    # sum_k smooth_k == 1:   loss_row = (m + lse) - weighted_sum.
    eps_over_k = eps / num_classes
    w = jnp.where(class_ids == t, (1.0 - eps) + eps_over_k, eps_over_k)
    weighted = jnp.sum(x * w, axis=1, keepdims=True)          # (tile_b, 1)

    loss_row = lse + m - weighted                             # (tile_b, 1)

    # Mask ragged-batch garbage rows (partial edge block), reduce to a scalar
    # partial sum, and store it in row 0 of this step's (8, 1) output block.
    row_ids = pl.program_id(0) * tile_b + jax.lax.broadcasted_iota(
        jnp.int32, (tile_b, 1), 0)
    masked = jnp.where(row_ids < b_true, loss_row, 0.0)
    partial = jnp.sum(masked)

    out_rows = jax.lax.broadcasted_iota(jnp.int32, (_SUBLANE, 1), 0)
    loss_ref[...] = jnp.where(out_rows == 0, partial, 0.0)


def cross_entropy_label_smooth(inputs, targets, num_classes, epsilon=0.1):
    """inputs: (B, K) float logits (f32 or bf16); targets: (B,) int labels -> scalar."""
    B, K = inputs.shape
    assert K == num_classes

    itemsize = jnp.dtype(inputs.dtype).itemsize

    # Generation-aware VMEM budget.
    vmem_cap = _vmem_capacity_bytes()
    if vmem_cap >= 100 * 1024 * 1024:        # v5e / v6e: 128 MiB physical VMEM
        vmem_limit = 64 * 1024 * 1024
    else:                                     # v7x: 64 MiB physical VMEM
        vmem_limit = 48 * 1024 * 1024

    # Per-row VMEM cost: double-buffered input tile + ~4 f32 full-tile temps
    # (upcast x, exp stream, select weight, product).  Size tile_b so the total
    # stays inside ~70% of the scoped limit.
    per_row_bytes = 2 * K * itemsize + 4 * K * 4
    budget = int(vmem_limit * 0.7)
    tile_b = max(_SUBLANE, (budget // per_row_bytes) // _SUBLANE * _SUBLANE)

    # Guarantee >= 2 grid steps (when B allows) so the "parallel" batch axis
    # actually shards across both TensorCores on v7x.
    half_b = ((B + 1) // 2 + _SUBLANE - 1) // _SUBLANE * _SUBLANE
    tile_b = min(tile_b, max(_SUBLANE, half_b))

    num_tiles = -(-B // tile_b)

    t2d = targets.astype(jnp.int32).reshape(B, 1)

    kernel = functools.partial(
        _ce_ls_kernel, eps=float(epsilon), num_classes=K, b_true=B,
        tile_b=tile_b)

    partials = pl.pallas_call(
        kernel,
        out_shape=jax.ShapeDtypeStruct((num_tiles * _SUBLANE, 1), jnp.float32),
        grid=(num_tiles,),
        in_specs=[
            pl.BlockSpec((tile_b, K), lambda i: (i, 0)),   # logits, unpadded K
            pl.BlockSpec((tile_b, 1), lambda i: (i, 0)),   # labels
        ],
        out_specs=pl.BlockSpec((_SUBLANE, 1), lambda i: (i, 0)),
        compiler_params=pltpu.CompilerParams(
            dimension_semantics=("parallel",),
            vmem_limit_bytes=vmem_limit),
    )(inputs, t2d)

    # Tiny epilogue reduction in XLA; divide by the *true* batch size.
    return jnp.sum(partials) / B


def _reference(logits, labels, num_classes, eps):
    lp = jax.nn.log_softmax(logits.astype(jnp.float32), axis=1)
    oh = jax.nn.one_hot(labels, num_classes, dtype=jnp.float32)
    sm = (1.0 - eps) * oh + eps / num_classes
    return jnp.sum(jnp.mean(-sm * lp, axis=0))


if __name__ == "__main__":
    key = jax.random.PRNGKey(0)
    k1, k2, k3, k4, k5, k6 = jax.random.split(key, 6)

    # Case 1: B=8, K=32 f32 (K not a multiple of 128, passed unpadded).
    B, K = 8, 32
    logits = jax.random.normal(k1, (B, K), dtype=jnp.float32)
    labels = jax.random.randint(k2, (B,), 0, K, dtype=jnp.int32)
    loss = jax.block_until_ready(
        cross_entropy_label_smooth(logits, labels, num_classes=K, epsilon=0.1))
    ref = _reference(logits, labels, K, 0.1)
    assert jnp.allclose(loss, ref, rtol=1e-5, atol=1e-5), (loss, ref)

    # Case 2: ragged batch (B not a multiple of the row tile) -> partial edge
    # block, exercises the in-kernel row mask.
    B2, K2 = 6, 32
    logits2 = jax.random.normal(k3, (B2, K2), dtype=jnp.float32)
    labels2 = jax.random.randint(k4, (B2,), 0, K2, dtype=jnp.int32)
    loss2 = jax.block_until_ready(
        cross_entropy_label_smooth(logits2, labels2, num_classes=K2, epsilon=0.1))
    ref2 = _reference(logits2, labels2, K2, 0.1)
    assert jnp.allclose(loss2, ref2, rtol=1e-5, atol=1e-5), (loss2, ref2)

    # Case 3: bf16 logits, multiple grid steps + ragged last tile.
    B3, K3 = 50, 200
    logits3 = jax.random.normal(k5, (B3, K3), dtype=jnp.bfloat16)
    labels3 = jax.random.randint(k6, (B3,), 0, K3, dtype=jnp.int32)
    loss3 = jax.block_until_ready(
        cross_entropy_label_smooth(logits3, labels3, num_classes=K3, epsilon=0.1))
    ref3 = _reference(logits3, labels3, K3, 0.1)
    assert jnp.allclose(loss3, ref3, rtol=1e-4, atol=1e-4), (loss3, ref3)

    print("KERNEL_OK")
</pallas_src>

<mosaic_0001>
module attributes {stable_mosaic.version = 11 : i64} {
  func.func @_ce_ls_kernel(%arg0: i32, %arg1: memref<8x32xf32, #tpu.memory_space<vmem>>, %arg2: memref<8x1xi32, #tpu.memory_space<vmem>>, %arg3: memref<8x1xf32, #tpu.memory_space<vmem>>) attributes {dimension_semantics = [#tpu.dimension_semantics<parallel>], iteration_bounds = array<i64: 1>, scalar_prefetch = 0 : i64, scratch_operands = 0 : i64, tpu.core_type = #tpu.core_type<tc>, window_params = [{transform_indices = @transform_0, window_bounds = array<i64: 8, 32>}, {transform_indices = @transform_1, window_bounds = array<i64: 8, 1>}, {transform_indices = @transform_2, window_bounds = array<i64: 8, 1>}]} {
    %c0 = arith.constant 0 : index
    %c0_0 = arith.constant 0 : index
    %0 = vector.load %arg1[%c0, %c0_0] : memref<8x32xf32, #tpu.memory_space<vmem>>, vector<8x32xf32>
    %c0_1 = arith.constant 0 : index
    %c0_2 = arith.constant 0 : index
    %1 = vector.load %arg2[%c0_1, %c0_2] : memref<8x1xi32, #tpu.memory_space<vmem>>, vector<8x1xi32>
    %2 = tpu.iota {dimensions = array<i32: 1>} : vector<1x32xi32>
    %cst = arith.constant dense<0xFF800000> : vector<8xf32>
    %3 = vector.multi_reduction <maximumf>, %0, %cst [1] : vector<8x32xf32> to vector<8xf32>
    %4 = vector.shape_cast %3 : vector<8xf32> to vector<8x1xf32>
    %5 = vector.broadcast %4 : vector<8x1xf32> to vector<8x32xf32>
    %6 = arith.subf %0, %5 : vector<8x32xf32>
    %7 = math.exp %6 : vector<8x32xf32>
    %cst_3 = arith.constant dense<0.000000e+00> : vector<8xf32>
    %8 = vector.multi_reduction <add>, %7, %cst_3 [1] : vector<8x32xf32> to vector<8xf32>
    %9 = vector.shape_cast %8 : vector<8xf32> to vector<8x1xf32>
    %10 = math.log %9 : vector<8x1xf32>
    %11 = vector.broadcast %2 : vector<1x32xi32> to vector<8x32xi32>
    %12 = vector.broadcast %1 : vector<8x1xi32> to vector<8x32xi32>
    %13 = arith.cmpi eq, %11, %12 : vector<8x32xi32>
    %cst_4 = arith.constant 0.903124988 : f32
    %cst_5 = arith.constant 3.125000e-03 : f32
    %14 = vector.broadcast %cst_4 : f32 to vector<8x32xf32>
    %15 = vector.broadcast %cst_5 : f32 to vector<8x32xf32>
    %16 = arith.select %13, %14, %15 : vector<8x32xi1>, vector<8x32xf32>
    %17 = arith.mulf %0, %16 : vector<8x32xf32>
    %cst_6 = arith.constant dense<0.000000e+00> : vector<8xf32>
    %18 = vector.multi_reduction <add>, %17, %cst_6 [1] : vector<8x32xf32> to vector<8xf32>
    %19 = vector.shape_cast %18 : vector<8xf32> to vector<8x1xf32>
    %20 = arith.addf %10, %4 : vector<8x1xf32>
    %21 = arith.subf %20, %19 : vector<8x1xf32>
    %c8_i32 = arith.constant 8 : i32
    %22 = arith.muli %arg0, %c8_i32 : i32
    %23 = tpu.iota {dimensions = array<i32: 0>} : vector<8x1xi32>
    %24 = vector.broadcast %22 : i32 to vector<8x1xi32>
    %25 = arith.addi %24, %23 : vector<8x1xi32>
    %c8_i32_7 = arith.constant 8 : i32
    %26 = vector.broadcast %c8_i32_7 : i32 to vector<8x1xi32>
    %27 = arith.cmpi slt, %25, %26 : vector<8x1xi32>
    %cst_8 = arith.constant 0.000000e+00 : f32
    %28 = vector.broadcast %cst_8 : f32 to vector<8x1xf32>
    %29 = arith.select %27, %21, %28 : vector<8x1xi1>, vector<8x1xf32>
    %30 = vector.shape_cast %29 : vector<8x1xf32> to vector<1x8x1xf32>
    %cst_9 = arith.constant dense<0.000000e+00> : vector<1xf32>
    %31 = vector.multi_reduction <add>, %30, %cst_9 [1, 2] : vector<1x8x1xf32> to vector<1xf32>
    %32 = vector.shape_cast %31 : vector<1xf32> to vector<1x1x1xf32>
    %33 = vector.extract %32[0, 0, 0] : f32 from vector<1x1x1xf32>
    %34 = tpu.iota {dimensions = array<i32: 0>} : vector<8x1xi32>
    %c0_i32 = arith.constant 0 : i32
    %35 = vector.broadcast %c0_i32 : i32 to vector<8x1xi32>
    %36 = arith.cmpi eq, %34, %35 : vector<8x1xi32>
    %cst_10 = arith.constant 0.000000e+00 : f32
    %37 = vector.broadcast %33 : f32 to vector<8x1xf32>
    %38 = vector.broadcast %cst_10 : f32 to vector<8x1xf32>
    %39 = arith.select %36, %37, %38 : vector<8x1xi1>, vector<8x1xf32>
    %c0_11 = arith.constant 0 : index
    %c0_12 = arith.constant 0 : index
    %40 = vector.load %arg3[%c0_11, %c0_12] : memref<8x1xf32, #tpu.memory_space<vmem>>, vector<8x1xf32>
    tpu.vector_store %arg3[%c0_11, %c0_12], %39 {strides = array<i32>} : memref<8x1xf32, #tpu.memory_space<vmem>>, vector<8x1xf32>,
    return
  }
  func.func @transform_0(%arg0: i32) -> (i32, i32) {
    %c0_i32 = arith.constant 0 : i32
    %c0_i32_0 = arith.constant 0 : i32
    return %arg0, %c0_i32 : i32, i32
  }
  func.func @transform_1(%arg0: i32) -> (i32, i32) {
    %c0_i32 = arith.constant 0 : i32
    %c0_i32_0 = arith.constant 0 : i32
    return %arg0, %c0_i32 : i32, i32
  }
  func.func @transform_2(%arg0: i32) -> (i32, i32) {
    %c0_i32 = arith.constant 0 : i32
    %c0_i32_0 = arith.constant 0 : i32
    return %arg0, %c0_i32 : i32, i32
  }
}

</mosaic_0001>

<bundles_post_ra>
// kernel: tpu_custom_call.1
= control target key start
LH: loop header
LB: loop body
LE: loop exit
PB: predicated region body
PF: predicated region fallthrough
CT: control target
= control target key end

     0   :  { %vm15_vm0 = vcmask 261120   ;;  %v73_v1 = vmov 0   ;;  %v13_v6 = vlaneseq  ;;  %v74_v10 = vmov 0.003125   ;;  %s104_s0 = inlined_call_operand.vmem [shape: f32[8,32], index: 0, kind: input, shape index: {}]   ;;  %s105_s1 = inlined_call_operand.vmem [shape: s32[8,1], index: 1, kind: input, shape index: {}]   ;;  %s106_s2 = inlined_call_operand.vmem [shape: f32[8,1], index: 2, kind: output, shape index: {}]  }
   0x1   :  { %v11_v0 = vld [vmem:[%s104_s0] sm:$0xff]  ;;  %68 = vset.pattern.permute.xlu0 %v73_v1  ;;  %vm45_vm2 = vcmask 7168  }
   0x2   :  { %v16_v2 = vsel %vm15_vm0, %v11_v0, -inf  ;;  %v12_v3 = vld [vmem:[%s105_s1] sm:$0xff]  ;;  %v14_v8 = vand.u32 127, %v13_v6  ;;  %v40_v30 = vshrl.u32 %v13_v6, 7 }
   0x3   :  { %17 = vmax.xlane.f32.xlu0 %v16_v2 }
   0x4   :  { %vm56_vm3 = vcmp.eq.s32.totalorder %v40_v30, 0 }
  0x19   :  { %28 = vperm.xlu0 %68, %v12_v3  }
  0x90   :  { %v18_v4 = vpop.xlane.xlu0 %17 }
  0x91   :  { %v19_v5 = vsub.f32 %v11_v0, %v18_v4 }
  0x93   :  { %v20_v7 = vmul.f32 1.442695, %v19_v5 }
  0x95   :  { %69 = vpow2.f32 %v20_v7 }
  0x98   :  { %v29_v9 = vpop.permute.xlu0 %28 }
  0x99   :  { %vm30_vm1 = vcmp.eq.s32.totalorder %v14_v8, %v29_v9 }
  0x9a   :  { %v31_v11 = vsel %vm30_vm1, 0.903125, %v74_v10 }
  0x9b   :  { %v32_v12 = vmul.f32 %v31_v11, %v11_v0 }
  0x9d   :  { %v33_v15 = vsel %vm15_vm0, %v32_v12, 0.0 }
  0x9f   :  { %v70_v13 = vpop.eup %69 }
  0xa0   :  { %v22_v14 = vsel %vm15_vm0, %v70_v13, 0.0 }
  0xa1   :  { %23 = vadd.xlane.f32.xlu1 %v22_v14 }
  0xa5   :  { %34 = vadd.xlane.f32.xlu1 %v33_v15 }
 0x12e   :  { %v24_v16 = vpop.xlane.xlu1 %23 }
 0x12f   :  { %71 = vlog2.f32 %v24_v16 }
 0x132   :  { %v35_v19 = vpop.xlane.xlu1 %34 }
 0x139   :  { %v72_v17 = vpop.eup %71 }
 0x13a   :  { %v26_v18 = vmul.f32 0.6931472, %v72_v17 }
 0x13c   :  { %v36_v20 = vadd.f32 %v26_v18, %v18_v4 }
 0x13e   :  { %v37_v21 = vsub.f32 %v36_v20, %v35_v19 }
 0x140   :  { %v46_v22 = vsel %vm45_vm2, %v37_v21, 0.0 }
 0x141   :  { %47 = vadd.xlane.f32.xlu1 %v46_v22 }
 0x1ce   :  { %v48_v23 = vpop.xlane.xlu1 %47 }
 0x1cf   :  { %v49_v24 = vrot.slane %v48_v23, 4 }
 0x1d1   :  { %v50_v25 = vadd.f32 %v49_v24, %v48_v23 }
 0x1d3   :  { %v51_v26 = vrot.slane %v50_v25, 2 }
 0x1d5   :  { %v52_v27 = vadd.f32 %v51_v26, %v50_v25 }
 0x1d7   :  { %v53_v28 = vrot.slane %v52_v27, 1 }
 0x1d9   :  { %v54_v29 = vadd.f32 %v53_v28, %v52_v27 }
 0x1db   :  { %64 = vpush %v54_v29 }
 0x20c   :  { %s65_s0 = spop %64 }
 0x20d   :  { %v57_v31 = vstv %s65_s0 }
 0x20e   :  { %v58_v32 = vsel %vm56_vm3, %v57_v31, 0.0 }
 0x20f   :  { %59 = vst.msk [vmem:[%s106_s2] sm:$0xff] %vm45_vm2, %v58_v32 }

</bundles_post_ra>
